<compile_context>
chip_gen: v6e
topology: v6e:2x2x1
jax: 0.10.0
libtpu: 0.0.40
codegen_flags: <defaults>
</compile_context>

<pallas_src>
import functools
import math

import jax
import jax.numpy as jnp
from jax.experimental import pallas as pl
from jax.experimental.pallas import tpu as pltpu

C1, C2 = 8, 16                          # stand-in UNet channel widths
_TAPS = [(dy, dx) for dy in range(3) for dx in range(3)]


# -----------------------------------------------------------------------------
# Roll-semantics probe (fixes the rotation sign once, at setup time)
# -----------------------------------------------------------------------------
def _probe_kernel(x_ref, o_ref):
    o_ref[...] = pltpu.roll(x_ref[...], 1, axis=1)


def _detect_roll_sign():
    """Returns +1 if pltpu.roll matches jnp.roll (out[i] = in[i - shift]),
    else -1.  Shifts in the main kernel are adjusted accordingly."""
    x = jnp.arange(128, dtype=jnp.float32).reshape(1, 128)
    y = pl.pallas_call(
        _probe_kernel,
        out_shape=jax.ShapeDtypeStruct((1, 128), jnp.float32),
    )(x)
    return 1 if int(y[0, 0]) == 127 else -1


# -----------------------------------------------------------------------------
# Fused UNet kernel
# -----------------------------------------------------------------------------
def _unet_fused_kernel(x_ref,
                       inc1_w, inc1_b, inc2_w, inc2_b,
                       down1_w, down1_b, down2_w, down2_b,
                       up1a_w, up1b_w, up1_b, up2_w, up2_b,
                       outc_w, outc_b,
                       o_ref, *, H, W, Hp, Wp, roll_sign):
    L = Hp * Wp

    def rollL(v, shift):
        # circular roll with jnp.roll semantics: out[j] = v[(j - shift) mod L]
        s = (shift * roll_sign) % L
        return pltpu.roll(v, s, axis=1) if s else v

    # padding masks (full-res interior grid and embedded stride-2 half-res grid)
    idx = jax.lax.broadcasted_iota(jnp.int32, (1, L), 1)
    row, col = idx // Wp, idx % Wp
    mask_full = ((row >= 1) & (row <= H) & (col >= 1) & (col <= W)
                 ).astype(jnp.float32)
    mask_half = ((row >= 2) & (row <= H) & (row % 2 == 0) &
                 (col >= 2) & (col <= W) & (col % 2 == 0)).astype(jnp.float32)

    def conv3x3(inputs, b_ref, mask, dil):
        """3x3 conv + bias + ReLU on zero-padded flat maps as 9 shifted bf16
        MXU matmuls with an f32 accumulator.  `inputs` is a list of
        (activation (Cin,L) f32, weights (9,Cout,Cin) bf16) pairs accumulated
        into the same accumulator (this replaces the channel concat)."""
        cout = inputs[0][1].shape[1]
        acc = jnp.zeros((cout, L), jnp.float32)
        for xv, wr in inputs:
            xb = xv.astype(jnp.bfloat16)
            for t, (dy, dx) in enumerate(_TAPS):
                d = ((dy - 1) * Wp + (dx - 1)) * dil
                acc = acc + jnp.dot(wr[t], rollL(xb, -d),
                                    preferred_element_type=jnp.float32)
        return jnp.maximum(acc + b_ref[...], 0.0) * mask

    x = x_ref[0]                                        # (3, L) f32, zero-padded

    # ---- encoder (full-res grid) -------------------------------------------
    x1 = conv3x3([(x, inc1_w)], inc1_b, mask_full, 1)
    x1 = conv3x3([(x1, inc2_w)], inc2_b, mask_full, 1)

    # ---- 2x2 / stride-2 max pool, result embedded on the stride-2 grid ------
    m = jnp.maximum(jnp.maximum(x1, rollL(x1, -1)),
                    jnp.maximum(rollL(x1, -Wp), rollL(x1, -(Wp + 1))))
    pooled = rollL(m, Wp + 1) * mask_half

    # ---- bottleneck: dilated convs on the embedded half-res grid ------------
    x2 = conv3x3([(pooled, down1_w)], down1_b, mask_half, 2)
    x2 = conv3x3([(x2, down2_w)], down2_b, mask_half, 2)

    # ---- nearest 2x upsample back onto the full-res grid --------------------
    xu = x2 + rollL(x2, -1) + rollL(x2, -Wp) + rollL(x2, -(Wp + 1))

    # ---- decoder: conv over concat([xu, x1]) == two accumulated matmul stacks
    x3 = conv3x3([(xu, up1a_w), (x1, up1b_w)], up1_b, mask_full, 1)
    x3 = conv3x3([(x3, up2_w)], up2_b, mask_full, 1)

    # ---- 1x1 out-conv (Cout=1) as VPU channel reduction + sigmoid epilogue --
    logit = jnp.sum(x3 * outc_w[...], axis=0, keepdims=True) + outc_b[...]
    sig = pl.reciprocal(1.0 + jnp.exp(-logit), approx=True)
    o_ref[0] = (sig * mask_full).astype(o_ref.dtype)


def unet_forward_fused(crops_nchw, kp, roll_sign):
    """crops_nchw: (N, 3, H, W) f32 -> sigmoid(UNet logits): (N, 1, H, W) f32."""
    N, cin, H, W = crops_nchw.shape
    assert cin == 3 and H % 2 == 0 and W % 2 == 0, "even crop sizes expected"
    # TODO(synk): for much larger crops, tile the spatial (lane) axis over an
    #             extra grid dimension and set vmem_limit_bytes (v7x: 64 MiB).
    Hp = H + 4
    Wp = max(64, pl.next_power_of_2(W + 3))
    L = Hp * Wp                                   # lane-dense: multiple of 128

    # zero-embed the crops: interior at rows/cols [1, H] / [1, W]
    xpad = jnp.zeros((N, 3, Hp, Wp), jnp.float32)
    xpad = xpad.at[:, :, 1:H + 1, 1:W + 1].set(crops_nchw.astype(jnp.float32))
    x_flat = xpad.reshape(N, 3, L)

    weights = [
        kp["inc1_w"], kp["inc1_b"], kp["inc2_w"], kp["inc2_b"],
        kp["down1_w"], kp["down1_b"], kp["down2_w"], kp["down2_b"],
        kp["up1a_w"], kp["up1b_w"], kp["up1_b"], kp["up2_w"], kp["up2_b"],
        kp["outc_w"], kp["outc_b"],
    ]

    def const_spec(a):
        imap = {2: (lambda i: (0, 0)), 3: (lambda i: (0, 0, 0))}[a.ndim]
        return pl.BlockSpec(a.shape, imap)

    kernel = functools.partial(_unet_fused_kernel, H=H, W=W, Hp=Hp, Wp=Wp,
                               roll_sign=roll_sign)
    out = pl.pallas_call(
        kernel,
        out_shape=jax.ShapeDtypeStruct((N, 1, L), jnp.float32),
        grid=(N,),
        in_specs=[pl.BlockSpec((1, 3, L), lambda i: (i, 0, 0))]
        + [const_spec(a) for a in weights],
        out_specs=pl.BlockSpec((1, 1, L), lambda i: (i, 0, 0)),
        compiler_params=pltpu.CompilerParams(
            dimension_semantics=("parallel",)),
    )(x_flat, *weights)

    out = out.reshape(N, Hp, Wp)[:, 1:H + 1, 1:W + 1]
    return out.reshape(N, 1, H, W)


# -----------------------------------------------------------------------------
# Stand-in UNet parameters + kernel-layout prep
# -----------------------------------------------------------------------------
def init_params(key):
    def conv_w(k, kh, kw, cin, cout):
        fan_in = kh * kw * cin
        return jax.random.normal(k, (kh, kw, cin, cout), jnp.float32) * math.sqrt(
            2.0 / fan_in)

    def bias(k, c):
        return jax.random.uniform(k, (c,), jnp.float32, -0.1, 0.1)

    ks = jax.random.split(key, 14)
    return {
        "inc1_w": conv_w(ks[0], 3, 3, 3, C1), "inc1_b": bias(ks[7], C1),
        "inc2_w": conv_w(ks[1], 3, 3, C1, C1), "inc2_b": bias(ks[8], C1),
        "down1_w": conv_w(ks[2], 3, 3, C1, C2), "down1_b": bias(ks[9], C2),
        "down2_w": conv_w(ks[3], 3, 3, C2, C2), "down2_b": bias(ks[10], C2),
        "up1_w": conv_w(ks[4], 3, 3, C2 + C1, C1), "up1_b": bias(ks[11], C1),
        "up2_w": conv_w(ks[5], 3, 3, C1, C1), "up2_b": bias(ks[12], C1),
        "outc_w": conv_w(ks[6], 1, 1, C1, 1)[0, 0], "outc_b": bias(ks[13], 1),
    }


def prep_params(p):
    """Repack weights for the kernel: tap-major (9, Cout, Cin) bf16 matrices,
    (C, 1) f32 biases, and the up1 weights split over the two concat halves."""
    def w9(w):                                   # (3,3,cin,cout) -> (9,cout,cin)
        cin, cout = w.shape[2], w.shape[3]
        return jnp.transpose(w, (0, 1, 3, 2)).reshape(9, cout, cin).astype(
            jnp.bfloat16)

    def b2(b):
        return b.reshape(-1, 1).astype(jnp.float32)

    return {
        "inc1_w": w9(p["inc1_w"]), "inc1_b": b2(p["inc1_b"]),
        "inc2_w": w9(p["inc2_w"]), "inc2_b": b2(p["inc2_b"]),
        "down1_w": w9(p["down1_w"]), "down1_b": b2(p["down1_b"]),
        "down2_w": w9(p["down2_w"]), "down2_b": b2(p["down2_b"]),
        "up1a_w": w9(p["up1_w"][:, :, :C2, :]),   # channels of the upsampled x2
        "up1b_w": w9(p["up1_w"][:, :, C2:, :]),   # channels of the x1 skip
        "up1_b": b2(p["up1_b"]),
        "up2_w": w9(p["up2_w"]), "up2_b": b2(p["up2_b"]),
        "outc_w": p["outc_w"].reshape(C1, 1).astype(jnp.float32),
        "outc_b": p["outc_b"].reshape(1, 1).astype(jnp.float32),
    }


# -----------------------------------------------------------------------------
# Plain-JAX (XLA) reference of the same stand-in UNet, for a self-check
# -----------------------------------------------------------------------------
def _conv3x3_ref(x_hwc, w, b):
    H, W, cin = x_hwc.shape
    cout = w.shape[-1]
    xp = jnp.pad(x_hwc, ((1, 1), (1, 1), (0, 0)))
    cols = [xp[dy:dy + H, dx:dx + W, :] for dy in range(3) for dx in range(3)]
    xcol = jnp.concatenate(cols, axis=-1).reshape(H * W, 9 * cin).astype(
        jnp.bfloat16)
    wm = w.reshape(9 * cin, cout).astype(jnp.bfloat16)
    y = jnp.dot(xcol, wm, preferred_element_type=jnp.float32) + b
    return jnp.maximum(y, 0.0).reshape(H, W, cout)


def _unet_reference(x_nchw, p):
    x = jnp.transpose(x_nchw[0], (1, 2, 0))
    x1 = _conv3x3_ref(x, p["inc1_w"], p["inc1_b"])
    x1 = _conv3x3_ref(x1, p["inc2_w"], p["inc2_b"])
    H, W, _ = x1.shape
    xd = jnp.max(jnp.max(x1.reshape(H // 2, 2, W // 2, 2, C1), axis=3), axis=1)
    x2 = _conv3x3_ref(xd, p["down1_w"], p["down1_b"])
    x2 = _conv3x3_ref(x2, p["down2_w"], p["down2_b"])
    xu = jnp.repeat(jnp.repeat(x2, 2, axis=0), 2, axis=1)
    xc = jnp.concatenate([xu, x1], axis=-1)
    x3 = _conv3x3_ref(xc, p["up1_w"], p["up1_b"])
    x3 = _conv3x3_ref(x3, p["up2_w"], p["up2_b"])
    logit = jnp.dot(x3.reshape(H * W, C1), p["outc_w"],
                    preferred_element_type=jnp.float32) + p["outc_b"]
    sig = (1.0 / (1.0 + jnp.exp(-logit))).reshape(H, W, 1)
    return jnp.transpose(sig, (2, 0, 1))[None]


# -----------------------------------------------------------------------------
# RACNN forward (crop logic mirrors the PyTorch reference)
# -----------------------------------------------------------------------------
def _crop_boxes(x):
    crops = []
    for idx in range(x.shape[0]):
        img = x[idx]                                    # (3, H, W)
        # TODO(synk): Faster-RCNN detector unavailable -> "no boxes" fallback.
        xmin, ymin, xmax, ymax = 0, 0, img.shape[2] - 1, img.shape[1] - 1
        padding = 10
        xmin = xmin - padding if xmin > padding else 0
        ymin = ymin - padding if ymin > padding else 0
        xmax = xmax + padding if xmax < img.shape[2] - padding else img.shape[2] - 1
        ymax = ymax + padding if ymax < img.shape[1] - padding else img.shape[1] - 1
        width = xmax - xmin
        height = ymax - ymin
        padding_ho = math.ceil(32 - width)
        padding_ve = math.ceil(32 - height)   # noqa: F841  (unused, as in reference)
        if width < 32:
            xmin -= math.ceil(padding_ho / 2)
            xmax += math.ceil(padding_ho / 2)
            if xmin < 0:
                xmax -= xmin
                xmin = 0
            if xmax >= img.shape[2]:
                xmin -= xmax - (img.shape[2] - 1)
                xmax = img.shape[2] - 1
        if height < 32:
            # NOTE: the reference reuses padding_ho here (not padding_ve); kept as-is.
            ymin -= math.ceil(padding_ho / 2)
            ymax += math.ceil(padding_ho / 2)
            if ymin < 0:
                ymax -= ymin
                ymin = 0
            if ymax >= img.shape[1]:
                ymin -= ymax - (img.shape[1] - 1)
                ymax = img.shape[1] - 1
        # NOTE: exclusive upper bound, matching the reference slicing semantics.
        crops.append({"box": (xmin, ymin, xmax, ymax),
                      "image": img[:, ymin:ymax, xmin:xmax]})
    return crops


def racnn_forward(x, kparams, roll_sign):
    """x: (N, 3, H, W) f32 NCHW.  Returns (logits2 list, crops list)."""
    crops = _crop_boxes(x)
    # All fallback crops share one shape -> batch them through a single fused
    # UNet pallas_call (sigmoid applied in-kernel).
    batch = jnp.stack([c["image"] for c in crops], axis=0)
    logits = unet_forward_fused(batch, kparams, roll_sign)   # (N, 1, h, w)
    logits2 = [logits[i:i + 1] for i in range(len(crops))]
    return logits2, crops


# -----------------------------------------------------------------------------
# Main
# -----------------------------------------------------------------------------
if __name__ == "__main__":
    key = jax.random.PRNGKey(0)
    # 33x33 images -> fallback crop is 32x32; batch = 2.
    x = jax.random.normal(key, (2, 3, 33, 33), dtype=jnp.float32)
    params = init_params(jax.random.PRNGKey(1))
    kparams = prep_params(params)
    roll_sign = _detect_roll_sign()

    logits2, crops = racnn_forward(x, kparams, roll_sign)
    for lg in logits2:
        jax.block_until_ready(lg)

    # self-check against the plain-JAX reference of the same stand-in UNet
    for lg, crop in zip(logits2, crops):
        ref = _unet_reference(crop["image"][None], params)
        err = float(jnp.max(jnp.abs(lg - ref)))
        assert err < 2e-2, f"kernel/reference mismatch: max abs err {err}"

    assert logits2[0].shape == (1, 1, 32, 32)
    assert crops[0]["image"].shape == (3, 32, 32)
    print("KERNEL_OK")
</pallas_src>

<mosaic_0001>
module attributes {stable_mosaic.version = 11 : i64} {
  func.func @_probe_kernel(%arg0: memref<1x128xf32, #tpu.memory_space<vmem>>, %arg1: memref<1x128xf32, #tpu.memory_space<vmem>>) attributes {dimension_semantics = [], scalar_prefetch = 0 : i64, scratch_operands = 0 : i64, tpu.core_type = #tpu.core_type<tc>} {
    %c0 = arith.constant 0 : index
    %c0_0 = arith.constant 0 : index
    %0 = vector.load %arg0[%c0, %c0_0] : memref<1x128xf32, #tpu.memory_space<vmem>>, vector<1x128xf32>
    %c1_i32 = arith.constant 1 : i32
    %1 = tpu.dynamic_rotate %0 by %c1_i32 dim 1 : vector<1x128xf32>, i32 -> vector<1x128xf32>
    %c0_1 = arith.constant 0 : index
    %c0_2 = arith.constant 0 : index
    %2 = vector.load %arg1[%c0_1, %c0_2] : memref<1x128xf32, #tpu.memory_space<vmem>>, vector<1x128xf32>
    tpu.vector_store %arg1[%c0_1, %c0_2], %1 {strides = array<i32>} : memref<1x128xf32, #tpu.memory_space<vmem>>, vector<1x128xf32>,
    return
  }
}

</mosaic_0001>

<bundles_post_ra>
// kernel: tpu_custom_call.1
= control target key start
LH: loop header
LB: loop body
LE: loop exit
PB: predicated region body
PF: predicated region fallthrough
CT: control target
= control target key end

     0   :  { %6 = vsyncpa [#allocation3], 0  ;;  %s106_s0 = inlined_call_operand.hbm [shape: f32[1,128], index: 0, kind: input, shape index: {}]   ;;  %s107_s1 = inlined_call_operand.hbm [shape: f32[1,128], index: 1, kind: output, shape index: {}]  }
   0x1   :  { %7 = vsyncpa [#allocation4], 0  ;;  %s87_s6 = smov [#allocation2]  }
   0x2   :  { %s14_s7 = sshll.u32 %s87_s6, 4  ;;  %s15_s7 = int_to_ptr.vmem [resolvable:$true] %s14_s7 }
   0x3   :  { %s51_s8 = scalar_lea.vmem %s15_s7, 16  ;;  %s55_s9 = scalar_lea.vmem %s15_s7, 32 }
   0x4   :  { %p52_p0 = scmp.ne.s32.totalorder %s15_s7, %s51_s8  ;;  %p56_p1 = scmp.lt.s32.totalorder %s15_s7, %s15_s7 }
   0x5   :  { %p57_p2 = scmp.lt.s32.totalorder %s55_s9, %s51_s8 }
   0x7   :  { %p58_p3 = por %p57_p2, %p56_p1 }
   0x9   :  { %p59_p4 = pnand %p58_p3, %p52_p0 }
   0xb   :  { %62 = shalt.err (!%p59_p4)
}
   0xc   :  { %17 = dma.hbm_to_vmem [thread:$0]  %s106_s0, 16, %s15_s7, [#allocation3]  }
   0xd   :  { %83 = dma.done.wait [#allocation3], 16  }
   0xe   :  { %84 = vsyncadd [#allocation3], 4294967280  ;;  %v21_v0 = vld [vmem:[#allocation2] sm:$0x1]  ;;  %s88_s12 = smov 1   ;;  %s89_s13 = smov [#allocation5]  }
   0xf   :  { %22 = vrot.lane.b32.xlu0 %v21_v0, %s88_s12  ;;  %s31_s14 = sshll.u32 %s89_s13, 4  ;;  %s32_s14 = int_to_ptr.vmem [resolvable:$true] %s31_s14 }
  0x10   :  { %s63_s15 = scalar_lea.vmem %s32_s14, 16  ;;  %s67_s16 = scalar_lea.vmem %s32_s14, 32 }
  0x11   :  { %p64_p5 = scmp.ne.s32.totalorder %s32_s14, %s63_s15  ;;  %p68_p6 = scmp.lt.s32.totalorder %s32_s14, %s32_s14 }
  0x12   :  { %p69_p7 = scmp.lt.s32.totalorder %s67_s16, %s63_s15 }
  0x14   :  { %p70_p8 = por %p69_p7, %p68_p6 }
  0x16   :  { %p71_p9 = pnand %p70_p8, %p64_p5 }
  0x81   :  { %v23_v1 = vpop.permute.xlu0 %22 }
  0x82   :  { %24 = vst [vmem:[#allocation5] sm:$0x1] %v23_v1 }
  0x83   :  { %74 = shalt.err (!%p71_p9)
}
  0x84   :  { %34 = dma.vmem_to_hbm [thread:$0]  %s32_s14, 16, %s107_s1, [#allocation4]  }
  0x85   :  { %85 = dma.done.wait [#allocation4], 16  }
  0x86   :  { %86 = vsyncadd [#allocation4], 4294967280 }
  0x87   :  { %38 = vsyncpa [#allocation3], 1 }
  0x88   :  { %39 = vsyncpa [#allocation4], 1 }

</bundles_post_ra>
